<compile_context>
chip_gen: v5e
topology: v5e:2x2
jax: 0.10.0
libtpu: 0.0.40
codegen_flags: <defaults>
</compile_context>

<pallas_src>
import functools

import jax
import jax.numpy as jnp
from jax.experimental import pallas as pl
from jax.experimental.pallas import tpu as pltpu

_MIB = 1 << 20


def _round_up(x, m):
    return ((x + m - 1) // m) * m


def _predictor_kernel(x_ref, w1_ref, b1_ref, w2_ref, b2s_ref, out_ref):
    # Cast x to the matmul dtype in-kernel (keeps HBM x traffic at its native
    # 4 B/elt; the cast rides on the VPU under the DMA).
    xb = x_ref[...].astype(w1_ref.dtype)

    # fc: [tm, inc] @ [inc, low_dim] with f32 MXU accumulation.
    h = jnp.dot(xb, w1_ref[...], preferred_element_type=jnp.float32) + b1_ref[...]

    # F.normalize(h, p=2, dim=1, eps=1e-12): scale = rsqrt(max(||h||^2, eps^2)).
    # The per-row scale is folded into the *20 (=1/0.05) multiply after the
    # second matmul (matmul is linear in its LHS rows) -> one fewer
    # (tm, low_dim) f32 multiply and one fewer live f32 temp.
    norm2 = jnp.sum(h * h, axis=-1, keepdims=True)
    scale = 20.0 * jax.lax.rsqrt(jnp.maximum(norm2, 1e-24))

    # fc2: [tm, low_dim] @ [low_dim, nc_pad].
    out = jnp.dot(h.astype(w2_ref.dtype), w2_ref[...],
                  preferred_element_type=jnp.float32)
    out_ref[...] = (out * scale + b2s_ref[...]).astype(out_ref.dtype)


def _vmem_bytes_estimate(block_m, inc, low_dim, nc_pad, x_itemsize, w_itemsize):
    x_tiles = 2 * block_m * inc * x_itemsize             # double-buffered x tile (f32)
    out_tiles = 2 * block_m * nc_pad * 4                 # double-buffered out tile
    weights = 2 * (inc * low_dim + low_dim * nc_pad) * w_itemsize
    biases = 2 * (low_dim + nc_pad) * 4
    temps = block_m * (inc * w_itemsize + 2 * low_dim * 4 + nc_pad * 4)
    return x_tiles + out_tiles + weights + biases + temps


def prepare_predictor_params(w1, b1, w2, b2, *, use_bf16=True):
    """One-time weight prep (hoisted out of the per-step forward): cast weights
    to the compute dtype, pad the class dim to a multiple of 128 (lane-dense
    output writes), and fold the 1/0.05 output scale into b2.

    w1: [inc, low_dim] (= fc.weight.T);   b1: [low_dim] or [1, low_dim]
    w2: [low_dim, num_class] (= fc2.weight.T);  b2: [num_class] or [1, num_class]
    """
    cd = jnp.bfloat16 if use_bf16 else jnp.float32
    low_dim = w1.shape[1]
    num_class = w2.shape[1]
    nc_pad = _round_up(max(num_class, 128), 128)

    w1c = w1.astype(cd)
    b1f = jnp.reshape(b1, (1, low_dim)).astype(jnp.float32)
    w2p = w2
    b2s = jnp.reshape(b2, (1, num_class)).astype(jnp.float32) * 20.0  # fold 1/0.05
    if nc_pad != num_class:
        w2p = jnp.pad(w2p, ((0, 0), (0, nc_pad - num_class)))
        b2s = jnp.pad(b2s, ((0, 0), (0, nc_pad - num_class)))
    return w1c, b1f, w2p.astype(cd), b2s.astype(jnp.float32), num_class


@functools.partial(jax.jit, static_argnames=("num_class", "block_m", "out_dtype"))
def predictor_deep_2_forward(x, w1c, b1f, w2p, b2s, *, num_class,
                             block_m=None, out_dtype=jnp.float32):
    """x: [B, inc] (f32); prepared params from prepare_predictor_params.
    Returns [B, num_class] = fc2(normalize(fc(x))) / 0.05."""
    B, inc = x.shape
    low_dim = w1c.shape[1]
    nc_pad = w2p.shape[1]
    x_sz = jnp.dtype(x.dtype).itemsize
    w_sz = jnp.dtype(w1c.dtype).itemsize

    if block_m is None:
        # Aim for ~4 grid steps once B is non-trivial (v7x: 2 TCs x >=2 pipelined
        # steps each); 16-row granularity; never larger than the (rounded) batch.
        block_m = min(512, max(128, _round_up(pl.cdiv(B, 4), 16)))
        block_m = min(block_m, _round_up(B, 16))
        # Keep the VMEM working set modest so big inc/low_dim still fits v5e's
        # 16 MiB scoped default and v7x's 64 MiB physical VMEM.
        while block_m > 128 and _vmem_bytes_estimate(
                block_m, inc, low_dim, nc_pad, x_sz, w_sz) > 28 * _MIB:
            block_m = max(128, _round_up(block_m // 2, 16))

    est = _vmem_bytes_estimate(block_m, inc, low_dim, nc_pad, x_sz, w_sz)
    vmem_limit = int(min(max(32 * _MIB, 2 * est), 56 * _MIB))

    grid = (pl.cdiv(B, block_m),)  # ragged tail: OOB reads are row-local, OOB writes masked

    out = pl.pallas_call(
        _predictor_kernel,
        out_shape=jax.ShapeDtypeStruct((B, nc_pad), out_dtype),
        grid_spec=pltpu.PrefetchScalarGridSpec(
            num_scalar_prefetch=0,
            grid=grid,
            in_specs=[
                pl.BlockSpec((block_m, inc), lambda i: (i, 0)),      # x tile (streamed, f32)
                pl.BlockSpec((inc, low_dim), lambda i: (0, 0)),      # W1 (grid-invariant)
                pl.BlockSpec((1, low_dim), lambda i: (0, 0)),        # b1
                pl.BlockSpec((low_dim, nc_pad), lambda i: (0, 0)),   # W2 (grid-invariant)
                pl.BlockSpec((1, nc_pad), lambda i: (0, 0)),         # b2 * 20
            ],
            out_specs=pl.BlockSpec((block_m, nc_pad), lambda i: (i, 0)),
        ),
        compiler_params=pltpu.CompilerParams(
            dimension_semantics=("parallel",),   # batch axis shards across TCs on v7x
            vmem_limit_bytes=vmem_limit,
        ),
    )(x, w1c, b1f, w2p, b2s)

    if nc_pad != num_class:
        out = out[:, :num_class]   # only the lane-pad slice; no batch pad/slice
    return out


def _xavier_normal(key, fan_in, fan_out):
    # nn.init.xavier_normal_: std = sqrt(2 / (fan_in + fan_out)).
    # PyTorch weight is [fan_out, fan_in]; we store its transpose [fan_in, fan_out].
    std = (2.0 / (fan_in + fan_out)) ** 0.5
    return jax.random.normal(key, (fan_in, fan_out), dtype=jnp.float32) * std


def reference_forward(x, w1, b1, w2, b2, use_bf16=True):
    """Pure-JAX reference mirroring the kernel's compute dtype."""
    cd = jnp.bfloat16 if use_bf16 else jnp.float32
    h = jnp.dot(x.astype(cd), w1.astype(cd),
                preferred_element_type=jnp.float32) + jnp.reshape(b1, (1, -1))
    norm = jnp.sqrt(jnp.sum(h * h, axis=-1, keepdims=True))
    h = h / jnp.maximum(norm, 1e-12)
    out = jnp.dot(h.astype(cd), w2.astype(cd),
                  preferred_element_type=jnp.float32) + jnp.reshape(b2, (1, -1))
    return out / 0.05


if __name__ == "__main__":
    # Small shapes consistent with Linear(inc, low_dim) -> Linear(low_dim, num_class).
    INC, LOW_DIM, NUM_CLASS = 256, 128, 64

    key = jax.random.PRNGKey(0)
    kx1, kx2, kx3, kw1, kw2, kb1, kb2 = jax.random.split(key, 7)

    # Xavier-normal weights (stored pre-transposed). Small non-zero biases for
    # coverage (weights_init zeroes them, but checkpoint-loaded models may not).
    w1 = _xavier_normal(kw1, INC, LOW_DIM)        # fc.weight.T
    w2 = _xavier_normal(kw2, LOW_DIM, NUM_CLASS)  # fc2.weight.T
    b1 = 0.01 * jax.random.normal(kb1, (LOW_DIM,), dtype=jnp.float32)
    b2 = 0.01 * jax.random.normal(kb2, (NUM_CLASS,), dtype=jnp.float32)

    # Weight prep happens once, outside the steady-state forward path.
    w1c, b1f, w2p, b2s, num_class = prepare_predictor_params(w1, b1, w2, b2)

    ok = True
    # B=8: single ragged block; B=10: non-multiple of tile; B=272: multi-step grid.
    for kx, B in ((kx1, 8), (kx2, 10), (kx3, 272)):
        x = jax.random.normal(kx, (B, INC), dtype=jnp.float32)
        out = jax.block_until_ready(
            predictor_deep_2_forward(x, w1c, b1f, w2p, b2s, num_class=num_class))
        ref = reference_forward(x, w1, b1, w2, b2)
        ok &= out.shape == (B, NUM_CLASS)
        ok &= bool(jnp.allclose(out, ref, atol=2e-2, rtol=2e-2))

    assert ok
    print("KERNEL_OK")
</pallas_src>

<mosaic_0001>
module attributes {stable_mosaic.version = 11 : i64} {
  func.func @_predictor_kernel(%arg0: i32, %arg1: memref<16x256xf32, #tpu.memory_space<vmem>>, %arg2: memref<256x128xbf16, #tpu.memory_space<vmem>>, %arg3: memref<1x128xf32, #tpu.memory_space<vmem>>, %arg4: memref<128x128xbf16, #tpu.memory_space<vmem>>, %arg5: memref<1x128xf32, #tpu.memory_space<vmem>>, %arg6: memref<16x128xf32, #tpu.memory_space<vmem>>) attributes {dimension_semantics = [#tpu.dimension_semantics<parallel>], iteration_bounds = array<i64: 1>, scalar_prefetch = 0 : i64, scratch_operands = 0 : i64, tpu.core_type = #tpu.core_type<tc>, window_params = [{transform_indices = @transform_0, window_bounds = array<i64: 16, 256>}, {pipeline_mode = #tpu.pipeline_mode<synchronous>, transform_indices = @transform_1, window_bounds = array<i64: 256, 128>}, {pipeline_mode = #tpu.pipeline_mode<synchronous>, transform_indices = @transform_2, window_bounds = array<i64: 1, 128>}, {pipeline_mode = #tpu.pipeline_mode<synchronous>, transform_indices = @transform_3, window_bounds = array<i64: 128, 128>}, {pipeline_mode = #tpu.pipeline_mode<synchronous>, transform_indices = @transform_4, window_bounds = array<i64: 1, 128>}, {transform_indices = @transform_5, window_bounds = array<i64: 16, 128>}]} {
    %c0 = arith.constant 0 : index
    %c0_0 = arith.constant 0 : index
    %0 = vector.load %arg1[%c0, %c0_0] : memref<16x256xf32, #tpu.memory_space<vmem>>, vector<16x256xf32>
    %1 = arith.truncf %0 : vector<16x256xf32> to vector<16x256xbf16>
    %c0_1 = arith.constant 0 : index
    %c0_2 = arith.constant 0 : index
    %2 = vector.load %arg2[%c0_1, %c0_2] : memref<256x128xbf16, #tpu.memory_space<vmem>>, vector<256x128xbf16>
    %cst = arith.constant dense<0.000000e+00> : vector<16x128xf32>
    %3 = tpu.matmul %1, %2, %cst {dimension_numbers = #tpu.dot_dimension_numbers<[1], [0], [0], [1], [0, 0, 1, 1], [], []>} : vector<16x256xbf16>, vector<256x128xbf16>, vector<16x128xf32> -> vector<16x128xf32>
    %c0_3 = arith.constant 0 : index
    %c0_4 = arith.constant 0 : index
    %4 = vector.load %arg3[%c0_3, %c0_4] : memref<1x128xf32, #tpu.memory_space<vmem>>, vector<1x128xf32>
    %5 = vector.broadcast %4 : vector<1x128xf32> to vector<16x128xf32>
    %6 = arith.addf %3, %5 : vector<16x128xf32>
    %7 = arith.mulf %6, %6 : vector<16x128xf32>
    %cst_5 = arith.constant dense<0.000000e+00> : vector<16xf32>
    %8 = vector.multi_reduction <add>, %7, %cst_5 [1] : vector<16x128xf32> to vector<16xf32>
    %9 = vector.shape_cast %8 : vector<16xf32> to vector<16x1xf32>
    %cst_6 = arith.constant 1.000000e-24 : f32
    %10 = vector.broadcast %cst_6 : f32 to vector<16x1xf32>
    %11 = arith.maximumf %9, %10 : vector<16x1xf32>
    %12 = math.rsqrt %11 : vector<16x1xf32>
    %cst_7 = arith.constant 2.000000e+01 : f32
    %13 = vector.broadcast %cst_7 : f32 to vector<16x1xf32>
    %14 = arith.mulf %13, %12 : vector<16x1xf32>
    %15 = arith.truncf %6 : vector<16x128xf32> to vector<16x128xbf16>
    %c0_8 = arith.constant 0 : index
    %c0_9 = arith.constant 0 : index
    %16 = vector.load %arg4[%c0_8, %c0_9] : memref<128x128xbf16, #tpu.memory_space<vmem>>, vector<128x128xbf16>
    %cst_10 = arith.constant dense<0.000000e+00> : vector<16x128xf32>
    %17 = tpu.matmul %15, %16, %cst_10 {dimension_numbers = #tpu.dot_dimension_numbers<[1], [0], [0], [1], [0, 0, 1, 1], [], []>} : vector<16x128xbf16>, vector<128x128xbf16>, vector<16x128xf32> -> vector<16x128xf32>
    %18 = vector.broadcast %14 : vector<16x1xf32> to vector<16x128xf32>
    %19 = arith.mulf %17, %18 : vector<16x128xf32>
    %c0_11 = arith.constant 0 : index
    %c0_12 = arith.constant 0 : index
    %20 = vector.load %arg5[%c0_11, %c0_12] : memref<1x128xf32, #tpu.memory_space<vmem>>, vector<1x128xf32>
    %21 = vector.broadcast %20 : vector<1x128xf32> to vector<16x128xf32>
    %22 = arith.addf %19, %21 : vector<16x128xf32>
    %c0_13 = arith.constant 0 : index
    %c0_14 = arith.constant 0 : index
    %23 = vector.load %arg6[%c0_13, %c0_14] : memref<16x128xf32, #tpu.memory_space<vmem>>, vector<16x128xf32>
    tpu.vector_store %arg6[%c0_13, %c0_14], %22 {strides = array<i32>} : memref<16x128xf32, #tpu.memory_space<vmem>>, vector<16x128xf32>,
    return
  }
  func.func @transform_0(%arg0: i32) -> (i32, i32) {
    %c0_i32 = arith.constant 0 : i32
    %c0_i32_0 = arith.constant 0 : i32
    return %arg0, %c0_i32 : i32, i32
  }
  func.func @transform_1(%arg0: i32) -> (i32, i32) {
    %c0_i32 = arith.constant 0 : i32
    %c0_i32_0 = arith.constant 0 : i32
    %c0_i32_1 = arith.constant 0 : i32
    return %c0_i32, %c0_i32_0 : i32, i32
  }
  func.func @transform_2(%arg0: i32) -> (i32, i32) {
    %c0_i32 = arith.constant 0 : i32
    %c0_i32_0 = arith.constant 0 : i32
    %c0_i32_1 = arith.constant 0 : i32
    return %c0_i32, %c0_i32_0 : i32, i32
  }
  func.func @transform_3(%arg0: i32) -> (i32, i32) {
    %c0_i32 = arith.constant 0 : i32
    %c0_i32_0 = arith.constant 0 : i32
    %c0_i32_1 = arith.constant 0 : i32
    return %c0_i32, %c0_i32_0 : i32, i32
  }
  func.func @transform_4(%arg0: i32) -> (i32, i32) {
    %c0_i32 = arith.constant 0 : i32
    %c0_i32_0 = arith.constant 0 : i32
    %c0_i32_1 = arith.constant 0 : i32
    return %c0_i32, %c0_i32_0 : i32, i32
  }
  func.func @transform_5(%arg0: i32) -> (i32, i32) {
    %c0_i32 = arith.constant 0 : i32
    %c0_i32_0 = arith.constant 0 : i32
    return %arg0, %c0_i32 : i32, i32
  }
}

</mosaic_0001>

<bundles_post_ra>
// kernel: predictor_deep_2_forward.1
= control target key start
LH: loop header
LB: loop body
LE: loop exit
PB: predicated region body
PF: predicated region fallthrough
CT: control target
= control target key end

     0   :  { %10 = vsyncpa [#allocation3], 0  ;;  %s669_s0 = inlined_call_operand.hbm [shape: f32[8,256], index: 0, kind: input, shape index: {}]   ;;  %s670_s1 = inlined_call_operand.hbm [shape: bf16[256,128], index: 1, kind: input, shape index: {}]   ;;  %s671_s2 = inlined_call_operand.vmem [shape: f32[1,128], index: 2, kind: input, shape index: {}]   ;;  %s672_s3 = inlined_call_operand.hbm [shape: bf16[128,128], index: 3, kind: input, shape index: {}]   ;;  %s673_s4 = inlined_call_operand.vmem [shape: f32[1,128], index: 4, kind: input, shape index: {}]   ;;  %s674_s5 = inlined_call_operand.hbm [shape: f32[8,128], index: 5, kind: output, shape index: {}]  }
   0x1   :  { %11 = vsyncpa [#allocation6], 0 }
   0x2   :  { %12 = vsyncpa [#allocation4], 0  ;;  %s30_s20 = sshll.u32 %s670_s1, 4  ;;  %s31_s20 = int_to_ptr.hbm [resolvable:$true] %s30_s20 }
   0x3   :  { %16 = vsyncadd [#allocation3], 256  ;;  %s611_s21 = smov [#allocation5]   ;;  %s17_s25 = sshll.u32 %s669_s0, 4  ;;  %s18_s25 = int_to_ptr.hbm [resolvable:$true] %s17_s25 }
   0x4   :  { %s32_s22 = sshll.u32 %s611_s21, 4  ;;  %s612_s26 = smov 64   ;;  %s33_s22 = int_to_ptr.vmem [resolvable:$true] %s32_s22 }
   0x5   :  { %s613_s27 = smov 4   ;;  %s614_s28 = smov [#allocation2]  }
   0x6   :  { %38 = dma.hbm_to_vmem [thread:$0]  %s31_s20, 2048, %s33_s22, [#allocation6], %s612_s26, %s612_s26, %s613_s27  }
   0x7   :  { %s19_s29 = sshll.u32 %s614_s28, 4  ;;  %s615_s30 = smov 256   ;;  %s20_s29 = int_to_ptr.vmem [resolvable:$true] %s19_s29 }
   0x8   :  { %s616_s6 = smov 16   ;;  %s45_s8 = sshll.u32 %s672_s3, 4  ;;  %s46_s8 = int_to_ptr.hbm [resolvable:$true] %s45_s8 }
   0x9   :  { %25 = dma.hbm_to_vmem [thread:$0]  %s18_s25, 256, %s20_s29, [#allocation3], %s615_s30, %s615_s30, %s616_s6  }
   0xa   :  { %s617_s9 = smov [#allocation7]  }
   0xb   :  { %s47_s10 = sshll.u32 %s617_s9, 4  ;;  %s48_s10 = int_to_ptr.vmem [resolvable:$true] %s47_s10 }
   0xc   :  { %53 = dma.hbm_to_vmem [thread:$0]  %s46_s8, 1024, %s48_s10, [#allocation6], %s612_s26, %s612_s26, %s613_s27  }
   0xd   :  { %605 = dma.done.wait [#allocation3], 512  }
   0xe   :  { %606 = vsyncadd [#allocation3], 4294966784 }
   0xf   :  { %607 = dma.done.wait [#allocation6], 3072  }
  0x10   :  { %608 = vsyncadd [#allocation6], 4294964224  ;;  %v476_v0 = vld [vmem:[#allocation5 + $0x38] sm:$0xff]  ;;  %v475_v2 = vld [vmem:[#allocation5 + $0x30] sm:$0xff] }
  0x11   :  { %v484_v1 = vld [vmem:[#allocation5 + $0x78] sm:$0xff]  ;;  %206 = vmatpush.bf16.msra.mxu0 %v476_v0  ;;  %v483_v3 = vld [vmem:[#allocation5 + $0x70] sm:$0xff]  ;;  %v474_v4 = vld [vmem:[#allocation5 + $0x28] sm:$0xff] }
  0x12   :  { %220 = vmatpush.bf16.msra.mxu1 %v484_v1  ;;  %v482_v5 = vld [vmem:[#allocation5 + $0x68] sm:$0xff]  ;;  %v492_v6 = vld [vmem:[#allocation7 + $0x38] sm:$0xff]  ;;  %v491_v7 = vld [vmem:[#allocation7 + $0x30] sm:$0xff] }
  0x13   :  { %329 = vmatpush.bf16.msra.mxu2 %v492_v6  ;;  %v473_v8 = vld [vmem:[#allocation5 + $0x20] sm:$0xff]  ;;  %v490_v10 = vld [vmem:[#allocation7 + $0x28] sm:$0xff]  ;;  %v472_v11 = vld [vmem:[#allocation5 + $0x18] sm:$0xff] }
  0x14   :  { %v481_v9 = vld [vmem:[#allocation5 + $0x60] sm:$0xff]  ;;  %v480_v12 = vld [vmem:[#allocation5 + $0x58] sm:$0xff]  ;;  %v471_v14 = vld [vmem:[#allocation5 + $0x10] sm:$0xff] }
  0x15   :  { %207 = vmatpush.bf16.msra.mxu0 %v475_v2  ;;  %v489_v13 = vld [vmem:[#allocation7 + $0x20] sm:$0xff]  ;;  %v479_v15 = vld [vmem:[#allocation5 + $0x50] sm:$0xff]  ;;  %v470_v16 = vld [vmem:[#allocation5 + $0x8] sm:$0xff] }
  0x16   :  { %221 = vmatpush.bf16.msra.mxu1 %v483_v3  ;;  %v478_v17 = vld [vmem:[#allocation5 + $0x48] sm:$0xff]  ;;  %v469_v18 = vld [vmem:[#allocation5] sm:$0xff]  ;;  %v70_v21 = vld [vmem:[#allocation2 + $0x10] sm:$0xff] }
  0x17   :  { %330 = vmatpush.bf16.msra.mxu2 %v491_v7  ;;  %v477_v19 = vld [vmem:[#allocation5 + $0x40] sm:$0xff]  ;;  %v69_v22 = vld [vmem:[#allocation2 + $0x8] sm:$0xff]  ;;  %v71_v23 = vld [vmem:[#allocation2 + $0x18] sm:$0xff] }
  0x18   :  { %v68_v20 = vld [vmem:[#allocation2] sm:$0xff]  ;;  %v73_v25 = vpack.c.bf16 %v71_v23, %v69_v22  ;;  %v488_v26 = vld [vmem:[#allocation7 + $0x18] sm:$0xff]  ;;  %v487_v27 = vld [vmem:[#allocation7 + $0x10] sm:$0xff] }
  0x19   :  { %208 = vmatpush.bf16.msra.mxu0 %v474_v4  ;;  %v72_v24 = vpack.c.bf16 %v70_v21, %v68_v20  ;;  %v486_v28 = vld [vmem:[#allocation7 + $0x8] sm:$0xff]  ;;  %v485_v29 = vld [vmem:[#allocation7] sm:$0xff] }
  0x1a   :  { %222 = vmatpush.bf16.msra.mxu1 %v482_v5  ;;  %v503_v30 = vld [vmem:[%s671_s2] ss:$0 sm:$0xff] }
  0x1b   :  { %331 = vmatpush.bf16.msra.mxu2 %v490_v10  ;;  %v504_v58 = vld [vmem:[%s673_s4] ss:$0 sm:$0xff] }
  0x1d   :  { %209 = vmatpush.bf16.msra.mxu0 %v473_v8 }
  0x1e   :  { %223 = vmatpush.bf16.msra.mxu1 %v481_v9 }
  0x1f   :  { %332 = vmatpush.bf16.msra.mxu2 %v489_v13 }
  0x21   :  { %210 = vmatpush.bf16.msra.mxu0 %v472_v11 }
  0x22   :  { %224 = vmatpush.bf16.msra.mxu1 %v480_v12 }
  0x23   :  { %333 = vmatpush.bf16.msra.mxu2 %v488_v26 }
  0x25   :  { %211 = vmatpush.bf16.msra.mxu0 %v471_v14 }
  0x26   :  { %225 = vmatpush.bf16.msra.mxu1 %v479_v15 }
  0x27   :  { %334 = vmatpush.bf16.msra.mxu2 %v487_v27 }
  0x29   :  { %212 = vmatpush.bf16.msra.mxu0 %v470_v16 }
  0x2a   :  { %226 = vmatpush.bf16.msra.mxu1 %v478_v17 }
  0x2b   :  { %335 = vmatpush.bf16.msra.mxu2 %v486_v28 }
  0x2d   :  { %213 = vmatpush.bf16.msra.mxu0 %v469_v18 }
  0x2e   :  { %227 = vmatpush.bf16.msra.mxu1 %v477_v19 }
  0x2f   :  { %336 = vmatpush.bf16.msra.mxu2 %v485_v29 }
  0x30   :  { %214 = vmatmul.bf16.vlgmr.msra.gmra.mxu0 %v72_v24 }
  0x31   :  { %228 = vmatmul.bf16.vlgmr.msra.gmra.mxu1 %v73_v25 }
  0xad   :  { %v215_v31 = vpop.f32.mrf.mxu0 }
  0xae   :  { %v229_v32 = vpop.f32.mrf.mxu1  ;;  %v216_v33 = vadd.f32 %v503_v30, %v215_v31 }
  0xb0   :  { %v230_v34 = vadd.f32 %v229_v32, %v216_v33 }
  0xb2   :  { %v234_v35 = vmul.f32 %v230_v34, %v230_v34 }
  0xb4   :  { %236 = vadd.xlane.f32.xlu0 %v234_v35 }
  0xb5   :  { %v217_v36 = vpop.f32.mrf.mxu0 }
  0xb6   :  { %v218_v37 = vadd.f32 %v503_v30, %v217_v36  ;;  %v231_v38 = vpop.f32.mrf.mxu1 }
  0xb8   :  { %v232_v39 = vadd.f32 %v231_v38, %v218_v37 }
  0xba   :  { %v264_v40 = vpack.c.bf16 %v232_v39, %v230_v34  ;;  %v235_v41 = vmul.f32 %v232_v39, %v232_v39 }
  0xbc   :  { %337 = vmatmul.bf16.vlgmr.msra.gmra.mxu2 %v264_v40  ;;  %238 = vadd.xlane.f32.xlu0 %v235_v41 }
 0x127   :  { %v237_v42 = vpop.xlane.xlu0 %236 }
 0x128   :  { %v240_v43 = vmax.f32 %v237_v42, 1e-24 }
 0x12a   :  { %505 = vrsqrt.f32 %v240_v43  ;;  %vm248_vm1 = vweird.f32 %v240_v43 }
 0x12f   :  { %v239_v44 = vpop.xlane.xlu0 %238 }
 0x130   :  { %v506_v45 = vpop.eup %505  ;;  %v241_v46 = vmax.f32 %v239_v44, 1e-24 }
 0x131   :  { %v243_v47 = vmul.f32 %v506_v45, %v240_v43  ;;  %vm249_vm0 = vweird.f32 %v506_v45 }
 0x132   :  { %507 = vrsqrt.f32 %v241_v46  ;;  %vm250_vm2 = vmor %vm248_vm1, %vm249_vm0  ;;  %vm258_vm4 = vweird.f32 %v241_v46 }
 0x133   :  { %v244_v48 = vmul.f32 %v506_v45, %v243_v47 }
 0x135   :  { %v245_v49 = vmul.f32 0.5, %v244_v48 }
 0x137   :  { %v246_v50 = vsub.f32 1.5, %v245_v49 }
 0x138   :  { %v508_v51 = vpop.eup %507 }
 0x139   :  { %v253_v52 = vmul.f32 %v508_v51, %v241_v46  ;;  %v247_v53 = vmul.f32 %v506_v45, %v246_v50  ;;  %vm259_vm3 = vweird.f32 %v508_v51 }
 0x13a   :  { %vm260_vm5 = vmor %vm258_vm4, %vm259_vm3 }
 0x13b   :  { %v254_v54 = vmul.f32 %v508_v51, %v253_v52  ;;  %v251_v55 = vsel %vm250_vm2, %v506_v45, %v247_v53 }
 0x13c   :  { %v262_v57 = vmul.f32 20.0, %v251_v55 }
 0x13d   :  { %v255_v56 = vmul.f32 0.5, %v254_v54 }
 0x13f   :  { %v256_v59 = vsub.f32 1.5, %v255_v56  ;;  %v338_v60 = vpop.f32.mrf.mxu2 }
 0x140   :  { %v343_v61 = vmul.f32 %v338_v60, %v262_v57 }
 0x141   :  { %v257_v62 = vmul.f32 %v508_v51, %v256_v59 }
 0x142   :  { %v349_v63 = vadd.f32 %v504_v58, %v343_v61 }
 0x143   :  { %v261_v0 = vsel %vm260_vm5, %v508_v51, %v257_v62 }
 0x144   :  { %351 = vst [vmem:[#allocation8] sm:$0xff] %v349_v63  ;;  %v263_v1 = vmul.f32 20.0, %v261_v0 }
 0x147   :  { %v340_v2 = vpop.f32.mrf.mxu2 }
 0x148   :  { %v344_v3 = vmul.f32 %v340_v2, %v263_v1 }
 0x14a   :  { %v350_v4 = vadd.f32 %v504_v58, %v344_v3 }
 0x14c   :  { %352 = vst [vmem:[#allocation8 + $0x8] sm:$0xff] %v350_v4 }
 0x14d   :  { %356 = vsyncadd [#allocation4], 128  ;;  %s359_s4 = sshll.u32 %s674_s5, 4  ;;  %s618_s14 = smov [#allocation8]   ;;  %s360_s4 = int_to_ptr.hbm [resolvable:$true] %s359_s4 }
 0x14e   :  { %s357_s15 = sshll.u32 %s618_s14, 4  ;;  %s619_s16 = smov 128   ;;  %s358_s15 = int_to_ptr.vmem [resolvable:$true] %s357_s15 }
 0x14f   :  { %s620_s17 = smov 8  }
 0x150   :  { %365 = dma.vmem_to_hbm [thread:$0]  %s358_s15, 128, %s360_s4, [#allocation4], %s619_s16, %s619_s16, %s620_s17  }
 0x151   :  { %609 = dma.done.wait [#allocation4], 256  }
 0x152   :  { %610 = vsyncadd [#allocation4], 4294967040 }
 0x153   :  { %370 = vsyncpa [#allocation3], 1 }
 0x154   :  { %371 = vsyncpa [#allocation6], 1 }
 0x155   :  { %372 = vsyncpa [#allocation4], 1 }

</bundles_post_ra>
